<compile_context>
chip_gen: v7x
topology: tpu7x:2x2x1
jax: 0.10.0
libtpu: 0.0.40
codegen_flags: <defaults>
</compile_context>

<pallas_src>
import functools

import jax
import jax.numpy as jnp
import numpy as np
from jax.experimental import pallas as pl
from jax.experimental.pallas import tpu as pltpu


def _round_up(x, m):
    return ((x + m - 1) // m) * m


def _attention_bias_kernel(vec_ref, ef_ref, col_ref, ws1g_ref, ws1e_ref,
                           ws2s_ref, wg_ref, out_ref, *, coeff, eps,
                           g_pad, nh_pad):
    f32 = jnp.float32
    prec = jax.lax.Precision.HIGHEST

    # ---- distance / unit-norm factor (feature-major: rows = xyz, lanes = edges)
    v0 = vec_ref[0:1, :]                                   # [1, TE]
    v1 = vec_ref[1:2, :]
    v2 = vec_ref[2:3, :]
    dist = jnp.sqrt(v0 * v0 + v1 * v1 + v2 * v2)           # [1, TE]
    d_eps = dist + eps
    inv = pl.reciprocal(d_eps, approx=True)                # EUP vrcp
    inv = inv * (2.0 - d_eps * inv)                        # one Newton step -> f32 accuracy
    r = dist * inv                                         # dist / (dist + eps), [1, TE]

    # ---- GaussianSmearing (offsets as a column -> [G_pad, TE], lane-dense)
    offs = col_ref[0:g_pad, 0:1]                           # [G_pad, 1]
    diff = dist - offs                                     # [G_pad, TE]
    dist_feat = jnp.exp(coeff * diff * diff)               # [G_pad, TE]

    # ---- lin_scalar_1 on [dist_feat ; tri_edge_feat]  (concat-free: two matmuls)
    z_sca = (jnp.dot(ws1g_ref[...], dist_feat,
                     preferred_element_type=f32, precision=prec) +
             jnp.dot(ws1e_ref[...], ef_ref[...],
                     preferred_element_type=f32, precision=prec))        # [S_hid, TE]

    # ---- lin_scalar_2 on [vnorm ; z_sca]; the vnorm part is rank-1 -> u * r
    u = col_ref[0:nh_pad, 1:2]                              # [NH_pad, 1]
    out_sca = u * r + jnp.dot(ws2s_ref[...], z_sca,
                              preferred_element_type=f32, precision=prec)  # [NH_pad, TE]

    # ---- gating + squared-sum of the (rank-1) vector output
    bg = col_ref[0:nh_pad, 2:3]                             # [NH_pad, 1]
    gate = jax.nn.sigmoid(
        jnp.dot(wg_ref[...], out_sca, preferred_element_type=f32, precision=prec) + bg)
    tsq = col_ref[0:nh_pad, 3:4]                            # [NH_pad, 1]
    out_vec = (gate * gate) * tsq * (r * r)                 # [NH_pad, TE]

    # fused lane-dense output slab: rows [0, NH_pad) = out_sca, [NH_pad, 2NH_pad) = out_vec
    out_ref[0:nh_pad, :] = out_sca.astype(out_ref.dtype)
    out_ref[nh_pad:2 * nh_pad, :] = out_vec.astype(out_ref.dtype)


def attention_bias_forward(tri_edge_index, tri_edge_feat, pos_compose, params,
                           *, coeff, eps=1e-7, block_edges=1024):
    """Returns (output_sca [E, num_heads], output_vec [E, num_heads])."""
    # TODO(synk): the data-dependent gather pos[node_a] - pos[node_b] stays in plain
    # JAX (XLA gather); pos_compose is tiny compared with the per-edge traffic.
    node_a = tri_edge_index[0]
    node_b = tri_edge_index[1]
    vector = (pos_compose[node_a] - pos_compose[node_b]).astype(jnp.float32)   # [E, 3]

    E, T = tri_edge_feat.shape
    G = params["offset"].shape[0]
    H, V_in = params["w1"].shape
    NH = params["w2"].shape[0]
    S_hid = params["ws1"].shape[0]

    # ---- tile sizing: lane axis = edges, TE multiple of 128, >=2 grid steps when
    #      possible so v7x's two TensorCores both get work (VMEM is not a limit here).
    block_edges = max(128, _round_up(block_edges, 128))
    TE = max(128, min(block_edges, _round_up((E + 1) // 2, 128)))
    E_pad = _round_up(E, TE)
    T_pad = _round_up(T, 8)
    G_pad = _round_up(G, 8)
    NH_pad = _round_up(NH, 8)

    # ---- feature-major (edge-on-lanes) data layout
    vec_fm = jnp.pad(vector.T, ((0, 8 - 3), (0, E_pad - E)))                       # [8, E_pad]
    ef_fm = jnp.pad(tri_edge_feat.astype(jnp.float32).T,
                    ((0, T_pad - T), (0, E_pad - E)))                              # [T_pad, E_pad]

    # ---- rank-1 collapse of the vector path (done once in the wrapper)
    w_edge = params["w_edge"].astype(jnp.float32)                                  # [V_in, 1]
    s = params["w1"].astype(jnp.float32) @ w_edge                                  # [H, 1]
    t = params["w2"].astype(jnp.float32) @ s                                       # [NH, 1]
    ws2 = params["ws2"].astype(jnp.float32)                                        # [NH, H+S_hid]
    u = ws2[:, :H] @ jnp.abs(s)                                                    # [NH, 1]
    tsq = t * t                                                                    # [NH, 1]

    # ---- scalar-path weights, feature-major & concat-free
    ws1 = params["ws1"].astype(jnp.float32)                                        # [S_hid, G+T]
    ws1g = jnp.pad(ws1[:, :G], ((0, 0), (0, G_pad - G)))                           # [S_hid, G_pad]
    ws1e = jnp.pad(ws1[:, G:], ((0, 0), (0, T_pad - T)))                           # [S_hid, T_pad]
    ws2s = jnp.pad(ws2[:, H:], ((0, NH_pad - NH), (0, 0)))                         # [NH_pad, S_hid]
    wg = jnp.pad(params["wg"].astype(jnp.float32),
                 ((0, NH_pad - NH), (0, NH_pad - NH)))                             # [NH_pad, NH_pad]

    # packed per-feature column slab: [offsets | u | bg | tsq]
    # padded gaussian offsets use a huge value so exp(coeff*diff^2) underflows to 0
    # (no reliance on zero weight rows for correctness).
    offs = jnp.pad(params["offset"].astype(jnp.float32), (0, G_pad - G),
                   constant_values=1e6)
    Rcol = max(G_pad, NH_pad)
    col = jnp.zeros((Rcol, 4), jnp.float32)
    col = col.at[:G_pad, 0].set(offs)
    col = col.at[:NH, 1].set(u[:, 0])
    col = col.at[:NH, 2].set(params["bg"].astype(jnp.float32))
    col = col.at[:NH, 3].set(tsq[:, 0])

    grid = (E_pad // TE,)

    def edge_map(i):
        return (0, i)

    def full_map(i):
        return (0, 0)

    in_specs = [
        pl.BlockSpec((8, TE), edge_map),            # vector (xyz rows, edge lanes)
        pl.BlockSpec((T_pad, TE), edge_map),        # tri_edge_feat (feature-major)
        pl.BlockSpec((Rcol, 4), full_map),          # [offsets | u | bg | tsq]
        pl.BlockSpec((S_hid, G_pad), full_map),     # lin_scalar_1 (gaussian part)
        pl.BlockSpec((S_hid, T_pad), full_map),     # lin_scalar_1 (edge-type part)
        pl.BlockSpec((NH_pad, S_hid), full_map),    # lin_scalar_2 (z_sca part)
        pl.BlockSpec((NH_pad, NH_pad), full_map),   # scalar_to_vector_gates weight
    ]
    out_specs = pl.BlockSpec((2 * NH_pad, TE), edge_map)

    flops = 2 * E_pad * (G_pad * S_hid + T_pad * S_hid + S_hid * NH_pad + NH_pad * NH_pad)
    transcendentals = E_pad * (G_pad + NH_pad + 3)
    bytes_accessed = 4 * (E_pad * (8 + T_pad + 2 * NH_pad)
                          + S_hid * (G_pad + T_pad) + NH_pad * (S_hid + NH_pad)
                          + Rcol * 4)

    fused = pl.pallas_call(
        functools.partial(_attention_bias_kernel, coeff=float(coeff),
                          eps=float(eps), g_pad=G_pad, nh_pad=NH_pad),
        grid=grid,
        in_specs=in_specs,
        out_specs=out_specs,
        out_shape=jax.ShapeDtypeStruct((2 * NH_pad, E_pad), jnp.float32),
        compiler_params=pltpu.CompilerParams(dimension_semantics=("parallel",)),
        cost_estimate=pl.CostEstimate(flops=int(flops),
                                      transcendentals=int(transcendentals),
                                      bytes_accessed=int(bytes_accessed)),
    )(vec_fm, ef_fm, col, ws1g, ws1e, ws2s, wg)

    out_sca = fused[:NH, :E].T
    out_vec = fused[NH_pad:NH_pad + NH, :E].T
    return out_sca, out_vec


def _reference(tri_edge_index, tri_edge_feat, pos_compose, params, *, coeff, eps=1e-7):
    """Pure-JAX reference mirroring the PyTorch AttentionBias forward."""
    node_a, node_b = tri_edge_index[0], tri_edge_index[1]
    vector = pos_compose[node_a] - pos_compose[node_b]
    dist = jnp.linalg.norm(vector, axis=-1)
    dist_feat = jnp.exp(coeff * (dist[:, None] - params["offset"][None, :]) ** 2)
    sca_feat = jnp.concatenate([dist_feat, tri_edge_feat], axis=-1)
    unit = vector / (jnp.linalg.norm(vector, axis=-1, keepdims=True) + eps)
    vec_feat = unit[:, None, :] * params["w_edge"][None, :, :]        # [E, V_in, 3]
    v_inter = jnp.einsum("evc,hv->ehc", vec_feat, params["w1"])       # [E, H, 3]
    vnorm = jnp.linalg.norm(v_inter, axis=-1)                         # [E, H]
    z_sca = sca_feat @ params["ws1"].T
    out_sca = jnp.concatenate([vnorm, z_sca], axis=-1) @ params["ws2"].T
    gate = jax.nn.sigmoid(out_sca @ params["wg"].T + params["bg"])[:, :, None]
    out_vec = gate * jnp.einsum("ehc,jh->ejc", v_inter, params["w2"])
    return out_sca, jnp.sum(out_vec * out_vec, axis=-1)


def init_params(key, num_heads, hidden_channels, cutoff, num_bond_types):
    num_edge_types = num_bond_types + 1
    num_gaussians = hidden_channels[0] - num_edge_types - 1
    in_vector = hidden_channels[1]
    hidden = max(in_vector, num_heads)        # GBLinear hidden_dim     (bottleneck = 1)
    sca_hidden = max(in_vector, num_heads)    # GBLinear sca_hidden_dim (bottleneck = 1)
    # Note: the PyTorch ctor passes hidden_channels[0] as GBLinear.in_scalar, but the
    # actual concatenated scalar feature width is num_gaussians + num_edge_types
    # (= hidden_channels[0] - 1); lin_scalar_1 is sized to the actual width so the
    # forward is well defined.
    in_scalar = num_gaussians + num_edge_types
    ks = jax.random.split(key, 7)
    return {
        "offset": jnp.linspace(0.0, cutoff, num_gaussians, dtype=jnp.float32),
        "w_edge": jax.random.uniform(ks[0], (in_vector, 1), jnp.float32, -0.1, 0.1),
        "w1": jax.random.uniform(ks[1], (hidden, in_vector), jnp.float32, -0.1, 0.1),
        "w2": jax.random.uniform(ks[2], (num_heads, hidden), jnp.float32, -0.1, 0.1),
        "ws1": jax.random.uniform(ks[3], (sca_hidden, in_scalar), jnp.float32, -0.1, 0.1),
        "ws2": jax.random.uniform(ks[4], (num_heads, hidden + sca_hidden), jnp.float32, -0.1, 0.1),
        "wg": jax.random.uniform(ks[5], (num_heads, num_heads), jnp.float32, -0.1, 0.1),
        "bg": jax.random.uniform(ks[6], (num_heads,), jnp.float32, -0.1, 0.1),
    }


if __name__ == "__main__":
    jax.config.update("jax_default_matmul_precision", "highest")

    num_heads = 16
    hidden_channels = (64, 64)
    cutoff = 10.0
    num_bond_types = 3
    num_edge_types = num_bond_types + 1                        # 4
    num_gaussians = hidden_channels[0] - num_edge_types - 1    # 59
    N_nodes, E = 48, 100

    key = jax.random.PRNGKey(0)
    kp, k1, k2, k3 = jax.random.split(key, 4)
    params = init_params(kp, num_heads, hidden_channels, cutoff, num_bond_types)
    coeff = -0.5 / (cutoff / (num_gaussians - 1)) ** 2         # GaussianSmearing coefficient

    pos_compose = jax.random.normal(k1, (N_nodes, 3), jnp.float32) * 3.0
    tri_edge_index = jax.random.randint(k2, (2, E), 0, N_nodes)
    tri_edge_feat = jax.random.normal(k3, (E, num_edge_types), jnp.float32)

    out_sca, out_vec = attention_bias_forward(tri_edge_index, tri_edge_feat,
                                              pos_compose, params, coeff=coeff)
    jax.block_until_ready((out_sca, out_vec))

    ref_sca, ref_vec = _reference(tri_edge_index, tri_edge_feat, pos_compose,
                                  params, coeff=coeff)
    np.testing.assert_allclose(np.asarray(out_sca), np.asarray(ref_sca),
                               rtol=1e-4, atol=1e-5)
    np.testing.assert_allclose(np.asarray(out_vec), np.asarray(ref_vec),
                               rtol=1e-4, atol=1e-5)

    print("KERNEL_OK")
</pallas_src>

<mosaic_0001>
module attributes {stable_mosaic.version = 11 : i64} {
  func.func @_attention_bias_kernel(%arg0: i32, %arg1: memref<8x128xf32, #tpu.memory_space<vmem>>, %arg2: memref<8x128xf32, #tpu.memory_space<vmem>>, %arg3: memref<64x4xf32, #tpu.memory_space<vmem>>, %arg4: memref<64x64xf32, #tpu.memory_space<vmem>>, %arg5: memref<64x8xf32, #tpu.memory_space<vmem>>, %arg6: memref<16x64xf32, #tpu.memory_space<vmem>>, %arg7: memref<16x16xf32, #tpu.memory_space<vmem>>, %arg8: memref<32x128xf32, #tpu.memory_space<vmem>>) attributes {dimension_semantics = [#tpu.dimension_semantics<parallel>], iteration_bounds = array<i64: 1>, scalar_prefetch = 0 : i64, scratch_operands = 0 : i64, tpu.core_type = #tpu.core_type<tc>, window_params = [{transform_indices = @transform_0, window_bounds = array<i64: 8, 128>}, {transform_indices = @transform_1, window_bounds = array<i64: 8, 128>}, {pipeline_mode = #tpu.pipeline_mode<synchronous>, transform_indices = @transform_2, window_bounds = array<i64: 64, 4>}, {pipeline_mode = #tpu.pipeline_mode<synchronous>, transform_indices = @transform_3, window_bounds = array<i64: 64, 64>}, {pipeline_mode = #tpu.pipeline_mode<synchronous>, transform_indices = @transform_4, window_bounds = array<i64: 64, 8>}, {pipeline_mode = #tpu.pipeline_mode<synchronous>, transform_indices = @transform_5, window_bounds = array<i64: 16, 64>}, {pipeline_mode = #tpu.pipeline_mode<synchronous>, transform_indices = @transform_6, window_bounds = array<i64: 16, 16>}, {transform_indices = @transform_7, window_bounds = array<i64: 32, 128>}]} {
    %c0 = arith.constant 0 : index
    %c0_0 = arith.constant 0 : index
    %0 = vector.load %arg1[%c0, %c0_0] : memref<8x128xf32, #tpu.memory_space<vmem>>, vector<1x128xf32>
    %c1 = arith.constant 1 : index
    %c0_1 = arith.constant 0 : index
    %1 = vector.load %arg1[%c1, %c0_1] : memref<8x128xf32, #tpu.memory_space<vmem>>, vector<1x128xf32>
    %c2 = arith.constant 2 : index
    %c0_2 = arith.constant 0 : index
    %2 = vector.load %arg1[%c2, %c0_2] : memref<8x128xf32, #tpu.memory_space<vmem>>, vector<1x128xf32>
    %3 = arith.mulf %0, %0 : vector<1x128xf32>
    %4 = arith.mulf %1, %1 : vector<1x128xf32>
    %5 = arith.addf %3, %4 : vector<1x128xf32>
    %6 = arith.mulf %2, %2 : vector<1x128xf32>
    %7 = arith.addf %5, %6 : vector<1x128xf32>
    %8 = math.sqrt %7 : vector<1x128xf32>
    %cst = arith.constant 1.000000e-07 : f32
    %9 = vector.broadcast %cst : f32 to vector<1x128xf32>
    %10 = arith.addf %8, %9 : vector<1x128xf32>
    %11 = tpu.reciprocal %10 {approx = true} : vector<1x128xf32> -> vector<1x128xf32>
    %12 = arith.mulf %10, %11 : vector<1x128xf32>
    %cst_3 = arith.constant 2.000000e+00 : f32
    %13 = vector.broadcast %cst_3 : f32 to vector<1x128xf32>
    %14 = arith.subf %13, %12 : vector<1x128xf32>
    %15 = arith.mulf %11, %14 : vector<1x128xf32>
    %16 = arith.mulf %8, %15 : vector<1x128xf32>
    %c0_4 = arith.constant 0 : index
    %c0_5 = arith.constant 0 : index
    %17 = vector.load %arg3[%c0_4, %c0_5] : memref<64x4xf32, #tpu.memory_space<vmem>>, vector<64x1xf32>
    %18 = vector.broadcast %8 : vector<1x128xf32> to vector<64x128xf32>
    %19 = vector.broadcast %17 : vector<64x1xf32> to vector<64x128xf32>
    %20 = arith.subf %18, %19 : vector<64x128xf32>
    %cst_6 = arith.constant -1.682000e+01 : f32
    %21 = vector.broadcast %cst_6 : f32 to vector<64x128xf32>
    %22 = arith.mulf %21, %20 : vector<64x128xf32>
    %23 = arith.mulf %22, %20 : vector<64x128xf32>
    %24 = math.exp %23 : vector<64x128xf32>
    %c0_7 = arith.constant 0 : index
    %c0_8 = arith.constant 0 : index
    %25 = vector.load %arg4[%c0_7, %c0_8] : memref<64x64xf32, #tpu.memory_space<vmem>>, vector<64x64xf32>
    %cst_9 = arith.constant dense<0.000000e+00> : vector<64x128xf32>
    %26 = tpu.matmul %25, %24, %cst_9 {dimension_numbers = #tpu.dot_dimension_numbers<[1], [0], [0], [1], [0, 0, 1, 1], [], []>, precision = #tpu.contract_precision<fp32>} : vector<64x64xf32>, vector<64x128xf32>, vector<64x128xf32> -> vector<64x128xf32>
    %c0_10 = arith.constant 0 : index
    %c0_11 = arith.constant 0 : index
    %27 = vector.load %arg5[%c0_10, %c0_11] : memref<64x8xf32, #tpu.memory_space<vmem>>, vector<64x8xf32>
    %c0_12 = arith.constant 0 : index
    %c0_13 = arith.constant 0 : index
    %28 = vector.load %arg2[%c0_12, %c0_13] : memref<8x128xf32, #tpu.memory_space<vmem>>, vector<8x128xf32>
    %cst_14 = arith.constant dense<0.000000e+00> : vector<64x128xf32>
    %29 = tpu.matmul %27, %28, %cst_14 {dimension_numbers = #tpu.dot_dimension_numbers<[1], [0], [0], [1], [0, 0, 1, 1], [], []>, precision = #tpu.contract_precision<fp32>} : vector<64x8xf32>, vector<8x128xf32>, vector<64x128xf32> -> vector<64x128xf32>
    %30 = arith.addf %26, %29 : vector<64x128xf32>
    %c0_15 = arith.constant 0 : index
    %c1_16 = arith.constant 1 : index
    %31 = vector.load %arg3[%c0_15, %c1_16] : memref<64x4xf32, #tpu.memory_space<vmem>>, vector<16x1xf32>
    %32 = vector.broadcast %31 : vector<16x1xf32> to vector<16x128xf32>
    %33 = vector.broadcast %16 : vector<1x128xf32> to vector<16x128xf32>
    %34 = arith.mulf %32, %33 : vector<16x128xf32>
    %c0_17 = arith.constant 0 : index
    %c0_18 = arith.constant 0 : index
    %35 = vector.load %arg6[%c0_17, %c0_18] : memref<16x64xf32, #tpu.memory_space<vmem>>, vector<16x64xf32>
    %cst_19 = arith.constant dense<0.000000e+00> : vector<16x128xf32>
    %36 = tpu.matmul %35, %30, %cst_19 {dimension_numbers = #tpu.dot_dimension_numbers<[1], [0], [0], [1], [0, 0, 1, 1], [], []>, precision = #tpu.contract_precision<fp32>} : vector<16x64xf32>, vector<64x128xf32>, vector<16x128xf32> -> vector<16x128xf32>
    %37 = arith.addf %34, %36 : vector<16x128xf32>
    %c0_20 = arith.constant 0 : index
    %c2_21 = arith.constant 2 : index
    %38 = vector.load %arg3[%c0_20, %c2_21] : memref<64x4xf32, #tpu.memory_space<vmem>>, vector<16x1xf32>
    %c0_22 = arith.constant 0 : index
    %c0_23 = arith.constant 0 : index
    %39 = vector.load %arg7[%c0_22, %c0_23] : memref<16x16xf32, #tpu.memory_space<vmem>>, vector<16x16xf32>
    %cst_24 = arith.constant dense<0.000000e+00> : vector<16x128xf32>
    %40 = tpu.matmul %39, %37, %cst_24 {dimension_numbers = #tpu.dot_dimension_numbers<[1], [0], [0], [1], [0, 0, 1, 1], [], []>, precision = #tpu.contract_precision<fp32>} : vector<16x16xf32>, vector<16x128xf32>, vector<16x128xf32> -> vector<16x128xf32>
    %41 = vector.broadcast %38 : vector<16x1xf32> to vector<16x128xf32>
    %42 = arith.addf %40, %41 : vector<16x128xf32>
    %43 = arith.negf %42 : vector<16x128xf32>
    %44 = math.exp %43 : vector<16x128xf32>
    %cst_25 = arith.constant 1.000000e+00 : f32
    %45 = vector.broadcast %cst_25 : f32 to vector<16x128xf32>
    %46 = arith.addf %45, %44 : vector<16x128xf32>
    %47 = arith.divf %45, %46 : vector<16x128xf32>
    %c0_26 = arith.constant 0 : index
    %c3 = arith.constant 3 : index
    %48 = vector.load %arg3[%c0_26, %c3] : memref<64x4xf32, #tpu.memory_space<vmem>>, vector<16x1xf32>
    %49 = arith.mulf %47, %47 : vector<16x128xf32>
    %50 = vector.broadcast %48 : vector<16x1xf32> to vector<16x128xf32>
    %51 = arith.mulf %49, %50 : vector<16x128xf32>
    %52 = arith.mulf %16, %16 : vector<1x128xf32>
    %53 = vector.broadcast %52 : vector<1x128xf32> to vector<16x128xf32>
    %54 = arith.mulf %51, %53 : vector<16x128xf32>
    %c0_27 = arith.constant 0 : index
    %c0_28 = arith.constant 0 : index
    %55 = vector.load %arg8[%c0_27, %c0_28] : memref<32x128xf32, #tpu.memory_space<vmem>>, vector<16x128xf32>
    tpu.vector_store %arg8[%c0_27, %c0_28], %37 {strides = array<i32>} : memref<32x128xf32, #tpu.memory_space<vmem>>, vector<16x128xf32>,
    %c16 = arith.constant 16 : index
    %c0_29 = arith.constant 0 : index
    %56 = vector.load %arg8[%c16, %c0_29] : memref<32x128xf32, #tpu.memory_space<vmem>>, vector<16x128xf32>
    tpu.vector_store %arg8[%c16, %c0_29], %54 {strides = array<i32>} : memref<32x128xf32, #tpu.memory_space<vmem>>, vector<16x128xf32>,
    return
  }
  func.func @transform_0(%arg0: i32) -> (i32, i32) {
    %c0_i32 = arith.constant 0 : i32
    %c0_i32_0 = arith.constant 0 : i32
    return %c0_i32, %arg0 : i32, i32
  }
  func.func @transform_1(%arg0: i32) -> (i32, i32) {
    %c0_i32 = arith.constant 0 : i32
    %c0_i32_0 = arith.constant 0 : i32
    return %c0_i32, %arg0 : i32, i32
  }
  func.func @transform_2(%arg0: i32) -> (i32, i32) {
    %c0_i32 = arith.constant 0 : i32
    %c0_i32_0 = arith.constant 0 : i32
    %c0_i32_1 = arith.constant 0 : i32
    return %c0_i32, %c0_i32_0 : i32, i32
  }
  func.func @transform_3(%arg0: i32) -> (i32, i32) {
    %c0_i32 = arith.constant 0 : i32
    %c0_i32_0 = arith.constant 0 : i32
    %c0_i32_1 = arith.constant 0 : i32
    return %c0_i32, %c0_i32_0 : i32, i32
  }
  func.func @transform_4(%arg0: i32) -> (i32, i32) {
    %c0_i32 = arith.constant 0 : i32
    %c0_i32_0 = arith.constant 0 : i32
    %c0_i32_1 = arith.constant 0 : i32
    return %c0_i32, %c0_i32_0 : i32, i32
  }
  func.func @transform_5(%arg0: i32) -> (i32, i32) {
    %c0_i32 = arith.constant 0 : i32
    %c0_i32_0 = arith.constant 0 : i32
    %c0_i32_1 = arith.constant 0 : i32
    return %c0_i32, %c0_i32_0 : i32, i32
  }
  func.func @transform_6(%arg0: i32) -> (i32, i32) {
    %c0_i32 = arith.constant 0 : i32
    %c0_i32_0 = arith.constant 0 : i32
    %c0_i32_1 = arith.constant 0 : i32
    return %c0_i32, %c0_i32_0 : i32, i32
  }
  func.func @transform_7(%arg0: i32) -> (i32, i32) {
    %c0_i32 = arith.constant 0 : i32
    %c0_i32_0 = arith.constant 0 : i32
    return %c0_i32, %arg0 : i32, i32
  }
}

</mosaic_0001>

<bundles_post_ra>
// kernel: tpu_custom_call.1
= control target key start
LH: loop header
LB: loop body
LE: loop exit
PB: predicated region body
PF: predicated region fallthrough
CT: control target
= control target key end

     0   :  { %v4007_v2 = vmov 0   ;;  %vm157_vm0 = vcmask 64512   ;;  %s4640_s0 = inlined_call_operand.vmem [shape: f32[8,128], index: 0, kind: input, shape index: {}]   ;;  %s4641_s1 = inlined_call_operand.vmem [shape: f32[8,128], index: 1, kind: input, shape index: {}]   ;;  %s4642_s2 = inlined_call_operand.vmem [shape: f32[64,4], index: 2, kind: input, shape index: {}]   ;;  %s4643_s3 = inlined_call_operand.vmem [shape: f32[64,64], index: 3, kind: input, shape index: {}]   ;;  %s4644_s4 = inlined_call_operand.vmem [shape: f32[64,8], index: 4, kind: input, shape index: {}]   ;;  %s4645_s5 = inlined_call_operand.vmem [shape: f32[16,64], index: 5, kind: input, shape index: {}]   ;;  %s4646_s6 = inlined_call_operand.vmem [shape: f32[16,16], index: 6, kind: input, shape index: {}]   ;;  %s4647_s7 = inlined_call_operand.hbm [shape: f32[32,128], index: 7, kind: output, shape index: {}]  }
   0x1   :  { %v50_v0 = vld [vmem:[%s4642_s2 + $0x10] sm:$0xff]  ;;  %v48_v1 = vld [vmem:[%s4642_s2] sm:$0xff]  ;;  %3948 = vset.pattern.permute.xlu1 %v4007_v2  ;;  %3947 = vset.pattern.permute.xlu0 %v4007_v2  ;;  %v51_v3 = vld [vmem:[%s4642_s2 + $0x18] sm:$0xff] }
   0x2   :  { %72 = vperm.xlu1 %3948, %v50_v0   ;;  %62 = vperm.xlu0 %3947, %v48_v1   ;;  %v49_v4 = vld [vmem:[%s4642_s2 + $0x8] sm:$0xff]  ;;  %v156_v5 = vld [vmem:[%s4641_s1] sm:$0xff]  ;;  %v150_v9 = vld [vmem:[%s4644_s4 + $0x10] sm:$0xff] }
   0x3   :  { %v4069_v6 = vand.u32 4294901760, %v156_v5  ;;  %v148_v7 = vld [vmem:[%s4644_s4] sm:$0xff]  ;;  %v149_v8 = vld [vmem:[%s4644_s4 + $0x8] sm:$0xff]  ;;  %v165_v12 = vsel %vm157_vm0, %v150_v9, 0  ;;  %v151_v13 = vld [vmem:[%s4644_s4 + $0x18] sm:$0xff] }
   0x4   :  { %v159_v10 = vsel %vm157_vm0, %v148_v7, 0  ;;  %v162_v11 = vsel %vm157_vm0, %v149_v8, 0  ;;  %v152_v14 = vld [vmem:[%s4644_s4 + $0x20] sm:$0xff]  ;;  %v4094_v17 = vand.u32 4294901760, %v165_v12  ;;  %v168_v18 = vsel %vm157_vm0, %v151_v13, 0  ;;  %v53_v19 = vld [vmem:[%s4642_s2 + $0x28] sm:$0xff] }
   0x5   :  { %3248 = vmatprep.subr.mxu0 %v4069_v6  ;;  %v4090_v15 = vand.u32 4294901760, %v159_v10  ;;  %v4092_v16 = vand.u32 4294901760, %v162_v11  ;;  %3206 = vmatprep.subr.mxu1 %v4069_v6  ;;  %v4101_v20 = vand.u32 4294901760, %v168_v18  ;;  %v4104_v21 = vsub.f32 %v156_v5, %v4069_v6  ;;  %v52_v23 = vld [vmem:[%s4642_s2 + $0x20] sm:$0xff]  ;;  %v153_v27 = vld [vmem:[%s4644_s4 + $0x28] sm:$0xff]  ;;  %v154_v28 = vld [vmem:[%s4644_s4 + $0x30] sm:$0xff] }
   0x6   :  { %77 = vperm.xlu1 %3948, %v51_v3   ;;  %67 = vperm.xlu0 %3947, %v49_v4   ;;  %v171_v22 = vsel %vm157_vm0, %v152_v14, 0  ;;  %v4118_v26 = vsub.f32 %v165_v12, %v4094_v17  ;;  %v155_v32 = vld [vmem:[%s4644_s4 + $0x38] sm:$0xff] }
   0x7   :  { %3249 = vmatpush3.msra.mxu0 %v4069_v6  ;;  %v4112_v24 = vsub.f32 %v159_v10, %v4090_v15  ;;  %v4115_v25 = vsub.f32 %v162_v11, %v4092_v16  ;;  %v4127_v29 = vsub.f32 %v168_v18, %v4101_v20  ;;  %v4130_v30 = vand.u32 4294901760, %v4104_v21  ;;  %3207 = vmatpush3.msra.mxu1 %v4069_v6 }
   0x8   :  { %v4132_v31 = vand.u32 4294901760, %v171_v22 }
   0x9   :  { %12 = vsyncpa [#allocation3], 0  ;;  %v250_v33 = vand.u32 4294901760, %v4112_v24  ;;  %v260_v34 = vand.u32 4294901760, %v4115_v25  ;;  %v270_v35 = vand.u32 4294901760, %v4118_v26  ;;  %v174_v37 = vsel %vm157_vm0, %v153_v27, 0  ;;  %3262 = vmatprep.subr.mxu0 %v4130_v30 }
   0xa   :  { %87 = vperm.xlu1 %3948, %v53_v19   ;;  %82 = vperm.xlu0 %3947, %v52_v23   ;;  %v4142_v36 = vsub.f32 %v171_v22, %v4132_v31  ;;  %v177_v38 = vsel %vm157_vm0, %v154_v28, 0  ;;  %v55_v39 = vld [vmem:[%s4642_s2 + $0x38] sm:$0xff]  ;;  %v54_v40 = vld [vmem:[%s4642_s2 + $0x30] sm:$0xff]  ;;  %v4153_v41 = vand.u32 4294901760, %v174_v37  ;;  %v180_v43 = vsel %vm157_vm0, %v155_v32, 0  ;;  %v140_v53 = vld [vmem:[%s4643_s3] sm:$0xff] }
   0xb   :  { %3250 = vmatprep.mubr.f32.mxu0 %v250_v33  ;;  %v4155_v42 = vand.u32 4294901760, %v177_v38  ;;  %v280_v44 = vand.u32 4294901760, %v4127_v29  ;;  %v4159_v45 = vand.u32 4294901760, %v180_v43  ;;  %vm929_vm1 = vcmask 523264   ;;  %v27_v14 = vld [vmem:[%s4640_s0] sm:$0x1] }
   0xc   :  { %3251 = vmatmul.mubr.f32.vlgmr.msra.gmra.mrb[0].mxu0 %v260_v34  ;;  %v290_v46 = vand.u32 4294901760, %v4142_v36  ;;  %v4166_v47 = vsub.f32 %v174_v37, %v4153_v41  ;;  %v931_v54 = vsel %vm929_vm1, %v140_v53, 0  ;;  %v251_v60 = vsub.f32 %v4112_v24, %v250_v33  ;;  %v29_v18 = vld [vmem:[%s4640_s0 + $0x2] sm:$0x1] }
   0xd   :  { %3253 = vmatprep.mubr.f32.mxu0 %v270_v35  ;;  %3263 = vmatpush3.msra.mxu0 %v4130_v30  ;;  %v4169_v48 = vsub.f32 %v177_v38, %v4155_v42  ;;  %v4174_v50 = vsub.f32 %v180_v43, %v4159_v45  ;;  %v4190_v55 = vand.u32 4294901760, %v931_v54  ;;  %v261_v61 = vsub.f32 %v4115_v25, %v260_v34 }
   0xe   :  { %97 = vperm.xlu1 %3948, %v55_v39   ;;  %92 = vperm.xlu0 %3947, %v54_v40   ;;  %v300_v49 = vand.u32 4294901760, %v4166_v47  ;;  %v252_v62 = vand.u32 4294901760, %v251_v60  ;;  %v271_v0 = vsub.f32 %v4118_v26, %v270_v35  ;;  %v281_v1 = vsub.f32 %v4127_v29, %v280_v44 }
   0xf   :  { %3276 = vmatprep.subr.mxu0 %v4069_v6  ;;  %v310_v51 = vand.u32 4294901760, %v4169_v48  ;;  %v320_v52 = vand.u32 4294901760, %v4174_v50  ;;  %v4195_v56 = vsub.f32 %v931_v54, %v4190_v55  ;;  %v262_v63 = vand.u32 4294901760, %v261_v61 }
  0x10   :  { %3254 = vmatmul.mubr.f32.gmra.mrb[2].mxu0 %v280_v44  ;;  %3208 = vmatprep.mubr.f32.mxu1 %v252_v62  ;;  %v272_v2 = vand.u32 4294901760, %v271_v0  ;;  %v282_v3 = vand.u32 4294901760, %v281_v1  ;;  %v291_v4 = vsub.f32 %v4142_v36, %v290_v46  ;;  %v301_v5 = vsub.f32 %v4166_v47, %v300_v49 }
  0x11   :  { %3256 = vmatprep.mubr.f32.mxu0 %v290_v46  ;;  %v1029_v57 = vand.u32 4294901760, %v4195_v56  ;;  %3209 = vmatmul.mubr.f32.vlgmr.msra.gmra.mrb[0].mxu1 %v262_v63  ;;  %v311_v8 = vsub.f32 %v4169_v48, %v310_v51  ;;  %v321_v9 = vsub.f32 %v4174_v50, %v320_v52  ;;  %v332_v12 = vsub.f32 %v4104_v21, %v4130_v30 }
  0x12   :  { %3211 = vmatprep.mubr.f32.mxu1 %v272_v2  ;;  %v302_v7 = vand.u32 4294901760, %v301_v5  ;;  %v56_v23 = vlaneseq  ;;  %vm2410_vm4 = vcmask 130048  }
  0x13   :  { %v1030_v58 = vsub.f32 %v4195_v56, %v1029_v57  ;;  %v312_v10 = vand.u32 4294901760, %v311_v8  ;;  %v322_v11 = vand.u32 4294901760, %v321_v9  ;;  %v333_v13 = vand.u32 4294901760, %v332_v12 }
  0x14   :  { %3257 = vmatmul.mubr.f32.gmra.mrb[4].mxu0 %v300_v49 }
  0x15   :  { %3259 = vmatprep.mubr.f32.mxu0 %v310_v51  ;;  %v1031_v59 = vand.u32 4294901760, %v1030_v58  ;;  %3212 = vmatmul.mubr.f32.gmra.mrb[2].mxu1 %v282_v3 }
  0x16   :  { %3220 = vmatprep.subr.mxu1 %v333_v13 }
  0x17   :  { %3221 = vmatpush3.msra.mxu1 %v333_v13  ;;  %v142_v13 = vld [vmem:[%s4643_s3 + $0x10] sm:$0xff] }
  0x18   :  { %3260 = vmatmul.mubr.f32.gmra.mrb[6].mxu0 %v320_v52  ;;  %3234 = vmatprep.subr.mxu1 %v4104_v21 }
  0x19   :  { %3264 = vmatprep.mubr.f32.mxu0 %v4090_v15 }
  0x1c   :  { %3265 = vmatmul.mubr.f32.vlgmr.msra.gmra.mrb[0].mxu0 %v4092_v16 }
  0x1d   :  { %3267 = vmatprep.mubr.f32.mxu0 %v4094_v17  ;;  %3277 = vmatpush3.msra.mxu0 %v4069_v6  ;;  %v292_v6 = vand.u32 4294901760, %v291_v4 }
  0x1f   :  { %3214 = vmatprep.mubr.f32.mxu1 %v292_v6  ;;  %v141_v6 = vld [vmem:[%s4643_s3 + $0x8] sm:$0xff] }
  0x20   :  { %3268 = vmatmul.mubr.f32.gmra.mrb[2].mxu0 %v4101_v20  ;;  %3215 = vmatmul.mubr.f32.gmra.mrb[4].mxu1 %v302_v7 }
  0x21   :  { %3270 = vmatprep.mubr.f32.mxu0 %v4132_v31  ;;  %3217 = vmatprep.mubr.f32.mxu1 %v312_v10  ;;  %v934_v10 = vsel %vm929_vm1, %v141_v6, 0 }
  0x24   :  { %3271 = vmatmul.mubr.f32.gmra.mrb[4].mxu0 %v4153_v41  ;;  %3218 = vmatmul.mubr.f32.gmra.mrb[6].mxu1 %v322_v11 }
  0x25   :  { %3273 = vmatprep.mubr.f32.mxu0 %v4155_v42  ;;  %3222 = vmatprep.mubr.f32.mxu1 %v4090_v15 }
  0x28   :  { %3274 = vmatmul.mubr.f32.gmra.mrb[6].mxu0 %v4159_v45  ;;  %3223 = vmatmul.mubr.f32.vlgmr.msra.gmra.mrb[0].mxu1 %v4092_v16 }
  0x29   :  { %3278 = vmatprep.mubr.f32.mxu0 %v4090_v15  ;;  %3225 = vmatprep.mubr.f32.mxu1 %v4094_v17  ;;  %v28_v15 = vld [vmem:[%s4640_s0 + $0x1] sm:$0x1] }
  0x2a   :  { %3235 = vmatpush3.msra.mxu1 %v4104_v21 }
  0x2c   :  { %3279 = vmatmul.mubr.f32.vlgmr.msra.gmra.mrb[0].mxu0 %v4092_v16  ;;  %3226 = vmatmul.mubr.f32.gmra.mrb[2].mxu1 %v4101_v20  ;;  %v30_v16 = vmul.f32 %v27_v14, %v27_v14  ;;  %v143_v14 = vld [vmem:[%s4643_s3 + $0x18] sm:$0xff] }
  0x2d   :  { %3281 = vmatprep.mubr.f32.mxu0 %v4094_v17  ;;  %3228 = vmatprep.mubr.f32.mxu1 %v4132_v31  ;;  %v31_v17 = vmul.f32 %v28_v15, %v28_v15 }
  0x2f   :  { %v32_v19 = vadd.f32 %v31_v17, %v30_v16  ;;  %v4263_v16 = vand.u32 4294901760, %v934_v10 }
  0x30   :  { %3282 = vmatmul.mubr.f32.gmra.mrb[2].mxu0 %v4101_v20  ;;  %3229 = vmatmul.mubr.f32.gmra.mrb[4].mxu1 %v4153_v41  ;;  %v33_v20 = vmul.f32 %v29_v18, %v29_v18 }
  0x31   :  { %3284 = vmatprep.mubr.f32.mxu0 %v4132_v31  ;;  %3231 = vmatprep.mubr.f32.mxu1 %v4155_v42 }
  0x32   :  { %v34_v21 = vadd.f32 %v33_v20, %v32_v19  ;;  %v937_v19 = vsel %vm929_vm1, %v142_v13, 0  ;;  %v940_v20 = vsel %vm929_vm1, %v143_v14, 0 }
  0x34   :  { %3285 = vmatmul.mubr.f32.gmra.mrb[4].mxu0 %v4153_v41  ;;  %3232 = vmatmul.mubr.f32.gmra.mrb[6].mxu1 %v4159_v45  ;;  %3955 = vrsqrt.f32 %v34_v21  ;;  %vm37_vm2 = vcmp.eq.f32.partialorder %v34_v21, inf  ;;  %vm39_vm3 = vcmp.eq.f32.partialorder %v34_v21, 0.0 }
  0x35   :  { %3287 = vmatprep.mubr.f32.mxu0 %v4155_v42  ;;  %3236 = vmatprep.mubr.f32.mxu1 %v4112_v24 }
  0x38   :  { %3288 = vmatmul.mubr.f32.gmra.mrb[6].mxu0 %v4159_v45  ;;  %3237 = vmatmul.mubr.f32.vlgmr.msra.gmra.mrb[0].mxu1 %v4115_v25  ;;  %v57_v25 = vshrl.u32 %v56_v23, 7  ;;  %v144_v23 = vld [vmem:[%s4643_s3 + $0x20] sm:$0xff] }
  0x39   :  { %3306 = vmatprep.mubr.f32.mxu0 %v1031_v59  ;;  %3239 = vmatprep.mubr.f32.mxu1 %v4118_v26  ;;  %v40_v26 = vand.u32 2147483648, %v34_v21 }
  0x3a   :  { %v4247_v28 = vsub.s32 0, %v57_v25  ;;  %v145_v25 = vld [vmem:[%s4643_s3 + $0x28] sm:$0xff] }
  0x3c   :  { %3240 = vmatmul.mubr.f32.gmra.mrb[2].mxu1 %v4127_v29 }
  0x3d   :  { %3242 = vmatprep.mubr.f32.mxu1 %v4142_v36 }
  0x3e   :  { %v3956_v22 = vpop.eup %3955 }
  0x3f   :  { %v36_v24 = vmul.f32 %v3956_v22, %v34_v21 }
  0x40   :  { %3243 = vmatmul.mubr.f32.gmra.mrb[4].mxu1 %v4166_v47 }
  0x41   :  { %3245 = vmatprep.mubr.f32.mxu1 %v4169_v48  ;;  %v38_v27 = vsel %vm37_vm2, %v34_v21, %v36_v24 }
  0x42   :  { %v4249_v29 = vsel %vm39_vm3, %v40_v26, %v38_v27  ;;  %v4274_v27 = vsub.f32 %v934_v10, %v4263_v16 }
  0x43   :  { %v59_v30 = vrot.slane %v4249_v29, %v4247_v28 }
  0x44   :  { %3246 = vmatmul.mubr.f32.gmra.mrb[6].mxu1 %v4174_v50 }
  0x81   :  { %v73_v31 = vpop.permute.xlu1 %72  ;;  %v63_v32 = vpop.permute.xlu0 %62 }
  0x82   :  { %v102_v33 = vsub.f32 %v59_v30, %v73_v31  ;;  %v100_v34 = vsub.f32 %v59_v30, %v63_v32  ;;  %v4278_v31 = vand.u32 4294901760, %v940_v20 }
  0x84   :  { %v110_v35 = vmul.f32 -16.82, %v102_v33  ;;  %v108_v36 = vmul.f32 -16.82, %v100_v34 }
  0x85   :  { %v78_v37 = vpop.permute.xlu1 %77  ;;  %v68_v38 = vpop.permute.xlu0 %67 }
  0x86   :  { %v118_v39 = vmul.f32 %v110_v35, %v102_v33  ;;  %v116_v40 = vmul.f32 %v108_v36, %v100_v34  ;;  %v103_v41 = vsub.f32 %v59_v30, %v78_v37  ;;  %v101_v42 = vsub.f32 %v59_v30, %v68_v38 }
  0x87   :  { %v943_v36 = vsel %vm929_vm1, %v144_v23, 0 }
  0x88   :  { %v124_v43 = vmul.f32 1.442695, %v116_v40  ;;  %v111_v44 = vmul.f32 -16.82, %v103_v41  ;;  %v128_v45 = vmul.f32 1.442695, %v118_v39 }
  0x89   :  { %v109_v46 = vmul.f32 -16.82, %v101_v42  ;;  %v88_v47 = vpop.permute.xlu1 %87  ;;  %v83_v48 = vpop.permute.xlu0 %82  ;;  %v946_v40 = vsel %vm929_vm1, %v145_v25, 0 }
  0x8a   :  { %v119_v49 = vmul.f32 %v111_v44, %v103_v41  ;;  %v105_v50 = vsub.f32 %v59_v30, %v88_v47  ;;  %v104_v51 = vsub.f32 %v59_v30, %v83_v48  ;;  %3957 = vpow2.f32 %v124_v43  ;;  %v146_v41 = vld [vmem:[%s4643_s3 + $0x30] sm:$0xff] }
  0x8b   :  { %v117_v52 = vmul.f32 %v109_v46, %v101_v42  ;;  %3959 = vpow2.f32 %v128_v45  ;;  %v147_v45 = vld [vmem:[%s4643_s3 + $0x38] sm:$0xff]  ;;  %v1039_v46 = vand.u32 4294901760, %v4274_v27 }
  0x8c   :  { %v130_v53 = vmul.f32 1.442695, %v119_v49  ;;  %v113_v54 = vmul.f32 -16.82, %v105_v50  ;;  %v112_v58 = vmul.f32 -16.82, %v104_v51 }
  0x8d   :  { %v126_v59 = vmul.f32 1.442695, %v117_v52  ;;  %v98_v60 = vpop.permute.xlu1 %97  ;;  %v93_v61 = vpop.permute.xlu0 %92  ;;  %v4307_v49 = vand.u32 4294901760, %v943_v36  ;;  %v4312_v52 = vsub.f32 %v940_v20, %v4278_v31 }
  0x8e   :  { %3961 = vpow2.f32 %v130_v53  ;;  %v121_v62 = vmul.f32 %v113_v54, %v105_v50  ;;  %v120_v63 = vmul.f32 %v112_v58, %v104_v51  ;;  %v107_v0 = vsub.f32 %v59_v30, %v98_v60 }
  0x8f   :  { %3963 = vpow2.f32 %v126_v59  ;;  %v106_v1 = vsub.f32 %v59_v30, %v93_v61  ;;  %v4276_v30 = vand.u32 4294901760, %v937_v19  ;;  %v4314_v53 = vand.u32 4294901760, %v946_v40 }
  0x90   :  { %v134_v2 = vmul.f32 1.442695, %v121_v62  ;;  %v132_v3 = vmul.f32 1.442695, %v120_v63  ;;  %v115_v4 = vmul.f32 -16.82, %v107_v0 }
  0x91   :  { %v114_v5 = vmul.f32 -16.82, %v106_v1  ;;  %v4305_v48 = vsub.f32 %v937_v19, %v4276_v30  ;;  %v949_v54 = vsel %vm929_vm1, %v146_v41, 0  ;;  %v952_v62 = vsel %vm929_vm1, %v147_v45, 0 }
  0x92   :  { %3965 = vpow2.f32 %v134_v2  ;;  %v123_v7 = vmul.f32 %v115_v4, %v107_v0  ;;  %v4334_v6 = vand.u32 4294901760, %v949_v54  ;;  %v4345_v10 = vsub.f32 %v946_v40, %v4314_v53 }
  0x93   :  { %3967 = vpow2.f32 %v132_v3  ;;  %v122_v8 = vmul.f32 %v114_v5, %v106_v1  ;;  %v1049_v4 = vand.u32 4294901760, %v4305_v48  ;;  %v4332_v5 = vsub.f32 %v943_v36, %v4307_v49 }
  0x94   :  { %v138_v9 = vmul.f32 1.442695, %v123_v7  ;;  %v3958_v11 = vpop.eup %3957  ;;  %v4351_v14 = vand.u32 4294901760, %v952_v62  ;;  %v4369_v23 = vsub.f32 %v949_v54, %v4334_v6 }
  0x95   :  { %v136_v12 = vmul.f32 1.442695, %v122_v8  ;;  %v3960_v15 = vpop.eup %3959  ;;  %v955_v18 = vand.u32 4294901760, %v3958_v11  ;;  %v1040_v8 = vsub.f32 %v4274_v27, %v1039_v46 }
  0x96   :  { %3969 = vpow2.f32 %v138_v9  ;;  %v961_v26 = vand.u32 4294901760, %v3960_v15  ;;  %v1059_v9 = vand.u32 4294901760, %v4312_v52 }
  0x97   :  { %3971 = vpow2.f32 %v136_v12  ;;  %v4282_v34 = vsub.f32 %v3958_v11, %v955_v18  ;;  %v1041_v25 = vand.u32 4294901760, %v1040_v8 }
  0x98   :  { %v3962_v17 = vpop.eup %3961  ;;  %v4302_v47 = vsub.f32 %v3960_v15, %v961_v26 }
  0x99   :  { %v3964_v21 = vpop.eup %3963  ;;  %v964_v22 = vand.u32 4294901760, %v3962_v17  ;;  %v1110_v51 = vand.u32 4294901760, %v4282_v34 }
  0x9a   :  { %v958_v24 = vand.u32 4294901760, %v3964_v21  ;;  %v1124_v3 = vand.u32 4294901760, %v4302_v47 }
  0x9b   :  { %v4287_v39 = vsub.f32 %v3962_v17, %v964_v22  ;;  %v4293_v42 = vpack.c.bf16 %v964_v22, %v961_v26  ;;  %v1111_v7 = vsub.f32 %v4282_v34, %v1110_v51  ;;  %v1069_v22 = vand.u32 4294901760, %v4332_v5 }
  0x9c   :  { %v3966_v32 = vpop.eup %3965  ;;  %v4280_v33 = vpack.c.bf16 %v958_v24, %v955_v18  ;;  %v4284_v35 = vsub.f32 %v3964_v21, %v958_v24  ;;  %v1125_v20 = vsub.f32 %v4302_v47, %v1124_v3  ;;  %v1050_v21 = vsub.f32 %v4305_v48, %v1049_v4 }
  0x9d   :  { %v3968_v37 = vpop.eup %3967  ;;  %v970_v38 = vand.u32 4294901760, %v3966_v32  ;;  %v1131_v60 = vand.u32 4294901760, %v4287_v39  ;;  %v1112_v24 = vand.u32 4294901760, %v1111_v7  ;;  %v1060_v26 = vsub.f32 %v4312_v52, %v1059_v9 }
  0x9e   :  { %v967_v43 = vand.u32 4294901760, %v3968_v37  ;;  %3615 = vmatprep.subr.bf16.mxu0 %v4280_v33  ;;  %v1117_v44 = vand.u32 4294901760, %v4284_v35  ;;  %v1051_v54 = vand.u32 4294901760, %v1050_v21 }
  0x9f   :  { %3617 = vmatpush3.bf16.msra.mxu0 %v4280_v33  ;;  %v4321_v61 = vsub.f32 %v3966_v32, %v970_v38  ;;  %v1132_v12 = vsub.f32 %v4287_v39, %v1131_v60 }
  0xa0   :  { %v3970_v50 = vpop.eup %3969  ;;  %3619 = vmatprep.subr.bf16.mxu0 %v4293_v42  ;;  %v1118_v59 = vsub.f32 %v4284_v35, %v1117_v44  ;;  %v4324_v63 = vpack.c.bf16 %v970_v38, %v967_v43  ;;  %v4326_v2 = vsub.f32 %v3968_v37, %v967_v43  ;;  %v1079_v37 = vand.u32 4294901760, %v4345_v10 }
  0xa1   :  { %v3972_v58 = vpop.eup %3971  ;;  %v976_v0 = vand.u32 4294901760, %v3970_v50  ;;  %v1145_v13 = vand.u32 4294901760, %v4321_v61  ;;  %v1133_v32 = vand.u32 4294901760, %v1132_v12  ;;  %v4380_v38 = vsub.f32 %v952_v62, %v4351_v14 }
  0xa2   :  { %v973_v1 = vand.u32 4294901760, %v3972_v58  ;;  %v1119_v11 = vand.u32 4294901760, %v1118_v59  ;;  %v1138_v17 = vand.u32 4294901760, %v4326_v2  ;;  %v1089_v59 = vand.u32 4294901760, %v4369_v23 }
  0xa3   :  { %3621 = vmatpush3.bf16.msra.mxu0 %v4293_v42  ;;  %v4358_v19 = vsub.f32 %v3970_v50, %v976_v0  ;;  %v1146_v36 = vsub.f32 %v4321_v61, %v1145_v13  ;;  %v1126_v50 = vand.u32 4294901760, %v1125_v20  ;;  %v1099_v7 = vand.u32 4294901760, %v4380_v38 }
  0xa4   :  { %3623 = vmatprep.subr.bf16.mxu0 %v4324_v63  ;;  %v4353_v15 = vpack.c.bf16 %v976_v0, %v973_v1  ;;  %v4356_v18 = vsub.f32 %v3972_v58, %v973_v1  ;;  %v3630_v40 = vpack.c.bf16 %v1119_v11, %v1112_v24  ;;  %v1139_v41 = vsub.f32 %v4326_v2, %v1138_v17 }
  0xa5   :  { %v1159_v45 = vand.u32 4294901760, %v4358_v19  ;;  %v1070_v58 = vsub.f32 %v4332_v5, %v1069_v22  ;;  %v3634_v62 = vpack.c.bf16 %v1133_v32, %v1126_v50  ;;  %v1061_v0 = vand.u32 4294901760, %v1060_v26 }
  0xa6   :  { %v1152_v43 = vand.u32 4294901760, %v4356_v18  ;;  %v1080_v1 = vsub.f32 %v4345_v10, %v1079_v37  ;;  %v1140_v8 = vand.u32 4294901760, %v1139_v41  ;;  %v1147_v11 = vand.u32 4294901760, %v1146_v36 }
  0xa7   :  { %3625 = vmatpush3.bf16.msra.mxu0 %v4324_v63  ;;  %v1160_v20 = vsub.f32 %v4358_v19, %v1159_v45  ;;  %v1071_v21 = vand.u32 4294901760, %v1070_v58  ;;  %v1090_v24 = vsub.f32 %v4369_v23, %v1089_v59  ;;  %v1100_v41 = vsub.f32 %v4380_v38, %v1099_v7 }
  0xa8   :  { %3627 = vmatprep.subr.bf16.mxu0 %v4353_v15  ;;  %v1153_v12 = vsub.f32 %v4356_v18, %v1152_v43  ;;  %v1081_v26 = vand.u32 4294901760, %v1080_v1  ;;  %v3646_v58 = vpack.c.bf16 %v4284_v35, %v4282_v34  ;;  %v3658_v1 = vpack.c.bf16 %v4358_v19, %v4356_v18 }
  0xa9   :  { %v1161_v36 = vand.u32 4294901760, %v1160_v20  ;;  %v1091_v50 = vand.u32 4294901760, %v1090_v24 }
  0xaa   :  { %v1154_v32 = vand.u32 4294901760, %v1153_v12 }
  0xab   :  { %3629 = vmatpush3.bf16.msra.mxu0 %v4353_v15 }
  0xac   :  { %3631 = vmatprep.subr.bf16.mxu0 %v3630_v40 }
  0xae   :  { %3307 = vmatmul.mubr.f32.vlgmr.msra.gmra.mrb[0].mxu0 %v1041_v25  ;;  %v3638_v25 = vpack.c.bf16 %v1147_v11, %v1140_v8  ;;  %v3678_v8 = vpack.c.bf16 %v1117_v44, %v1110_v51  ;;  %v3682_v11 = vpack.c.bf16 %v1131_v60, %v1124_v3  ;;  %v4517_v51 = vld [vmem:[%s4642_s2 + $0x8] sm:$0xff] }
  0xaf   :  { %3633 = vmatpush3.bf16.msra.mxu0 %v3630_v40  ;;  %3309 = vmatprep.mubr.f32.mxu0 %v1051_v54  ;;  %v3642_v40 = vpack.c.bf16 %v1161_v36, %v1154_v32  ;;  %v1101_v54 = vand.u32 4294901760, %v1100_v41  ;;  %v1811_v60 = vld [vmem:[%s4645_s5 + $0x8] sm:$0xff] }
  0xb0   :  { %3635 = vmatprep.subr.bf16.mxu0 %v3634_v62 }
  0xb2   :  { %3310 = vmatmul.mubr.f32.gmra.mrb[2].mxu0 %v1061_v0  ;;  %v3654_v0 = vpack.c.bf16 %v4321_v61, %v4326_v2 }
  0xb3   :  { %3637 = vmatpush3.bf16.msra.mxu0 %v3634_v62  ;;  %3312 = vmatprep.mubr.f32.mxu0 %v1071_v21  ;;  %v3650_v62 = vpack.c.bf16 %v4287_v39, %v4302_v47 }
  0xb4   :  { %3639 = vmatprep.subr.bf16.mxu0 %v3638_v25 }
  0xb6   :  { %3313 = vmatmul.mubr.f32.gmra.mrb[4].mxu0 %v1081_v26 }
  0xb7   :  { %3641 = vmatpush3.bf16.msra.mxu0 %v3638_v25  ;;  %3315 = vmatprep.mubr.f32.mxu0 %v1091_v50 }
  0xb8   :  { %3643 = vmatprep.subr.bf16.mxu0 %v3642_v40 }
  0xba   :  { %3316 = vmatmul.mubr.f32.gmra.mrb[6].mxu0 %v1101_v54 }
  0xbb   :  { %3645 = vmatpush3.bf16.msra.mxu0 %v3642_v40  ;;  %3334 = vmatprep.mubr.f32.mxu0 %v4190_v55 }
  0xbc   :  { %3647 = vmatprep.subr.bf16.mxu0 %v3646_v58 }
  0xbe   :  { %3335 = vmatmul.mubr.f32.vlgmr.msra.gmra.mrb[0].mxu0 %v4263_v16 }
  0xbf   :  { %3649 = vmatpush3.bf16.msra.mxu0 %v3646_v58  ;;  %3337 = vmatprep.mubr.f32.mxu0 %v4276_v30 }
  0xc0   :  { %3651 = vmatprep.subr.bf16.mxu0 %v3650_v62 }
  0xc2   :  { %3338 = vmatmul.mubr.f32.gmra.mrb[2].mxu0 %v4278_v31 }
  0xc3   :  { %3653 = vmatpush3.bf16.msra.mxu0 %v3650_v62  ;;  %3340 = vmatprep.mubr.f32.mxu0 %v4307_v49 }
  0xc4   :  { %3655 = vmatprep.subr.bf16.mxu0 %v3654_v0 }
  0xc6   :  { %3341 = vmatmul.mubr.f32.gmra.mrb[4].mxu0 %v4314_v53 }
  0xc7   :  { %3657 = vmatpush3.bf16.msra.mxu0 %v3654_v0  ;;  %3343 = vmatprep.mubr.f32.mxu0 %v4334_v6 }
  0xc8   :  { %3659 = vmatprep.subr.bf16.mxu0 %v3658_v1 }
  0xca   :  { %3344 = vmatmul.mubr.f32.gmra.mrb[6].mxu0 %v4351_v14 }
  0xcb   :  { %3661 = vmatpush3.bf16.msra.mxu0 %v3658_v1  ;;  %3362 = vmatprep.mubr.f32.mxu0 %v4195_v56  ;;  %v3686_v56 = vpack.c.bf16 %v1145_v13, %v1138_v17 }
  0xcc   :  { %3663 = vmatprep.subr.bf16.mxu0 %v4280_v33 }
  0xce   :  { %3363 = vmatmul.mubr.f32.vlgmr.msra.gmra.mrb[0].mxu0 %v4274_v27 }
  0xcf   :  { %3665 = vmatpush3.bf16.msra.mxu0 %v4280_v33  ;;  %3365 = vmatprep.mubr.f32.mxu0 %v4305_v48 }
  0xd0   :  { %3667 = vmatprep.subr.bf16.mxu0 %v4293_v42 }
  0xd2   :  { %3366 = vmatmul.mubr.f32.gmra.mrb[2].mxu0 %v4312_v52  ;;  %v4522_v52 = vld [vmem:[%s4642_s2] sm:$0xff] }
  0xd3   :  { %3669 = vmatpush3.bf16.msra.mxu0 %v4293_v42  ;;  %3368 = vmatprep.mubr.f32.mxu0 %v4332_v5 }
  0xd4   :  { %3671 = vmatprep.subr.bf16.mxu0 %v4324_v63 }
  0xd6   :  { %3369 = vmatmul.mubr.f32.gmra.mrb[4].mxu0 %v4345_v10 }
  0xd7   :  { %3673 = vmatpush3.bf16.msra.mxu0 %v4324_v63  ;;  %3371 = vmatprep.mubr.f32.mxu0 %v4369_v23 }
  0xd8   :  { %3675 = vmatprep.subr.bf16.mxu0 %v4353_v15 }
  0xda   :  { %3372 = vmatmul.mubr.f32.gmra.mrb[6].mxu0 %v4380_v38 }
  0xdb   :  { %3677 = vmatpush3.bf16.msra.mxu0 %v4353_v15  ;;  %3390 = vmatprep.mubr.f32.mxu0 %v1029_v57  ;;  %v3690_v57 = vpack.c.bf16 %v1159_v45, %v1152_v43 }
  0xdc   :  { %3679 = vmatprep.subr.bf16.mxu0 %v3678_v8 }
  0xde   :  { %3391 = vmatmul.mubr.f32.vlgmr.msra.gmra.mrb[0].mxu0 %v1039_v46 }
  0xdf   :  { %3681 = vmatpush3.bf16.msra.mxu0 %v3678_v8  ;;  %3393 = vmatprep.mubr.f32.mxu0 %v1049_v4  ;;  %v1816_v4 = vsel %vm929_vm1, %v1811_v60, 0 }
  0xe0   :  { %3683 = vmatprep.subr.bf16.mxu0 %v3682_v11 }
  0xe2   :  { %3394 = vmatmul.mubr.f32.gmra.mrb[2].mxu0 %v1059_v9 }
  0xe3   :  { %3685 = vmatpush3.bf16.msra.mxu0 %v3682_v11  ;;  %3396 = vmatprep.mubr.f32.mxu0 %v1069_v22 }
  0xe4   :  { %3687 = vmatprep.subr.bf16.mxu0 %v3686_v56 }
  0xe6   :  { %3397 = vmatmul.mubr.f32.gmra.mrb[4].mxu0 %v1079_v37 }
  0xe7   :  { %3689 = vmatpush3.bf16.msra.mxu0 %v3686_v56  ;;  %3399 = vmatprep.mubr.f32.mxu0 %v1089_v59 }
  0xe8   :  { %3691 = vmatprep.subr.bf16.mxu0 %v3690_v57 }
  0xea   :  { %3400 = vmatmul.mubr.f32.gmra.mrb[6].mxu0 %v1099_v7 }
  0xeb   :  { %3693 = vmatpush3.bf16.msra.mxu0 %v3690_v57  ;;  %3418 = vmatprep.mubr.f32.mxu0 %v4190_v55 }
  0xec   :  { %3695 = vmatprep.subr.bf16.mxu0 %v4280_v33 }
  0xee   :  { %3419 = vmatmul.mubr.f32.vlgmr.msra.gmra.mrb[0].mxu0 %v4263_v16 }
  0xef   :  { %3697 = vmatpush3.bf16.msra.mxu0 %v4280_v33  ;;  %3421 = vmatprep.mubr.f32.mxu0 %v4276_v30 }
  0xf0   :  { %3699 = vmatprep.subr.bf16.mxu0 %v4293_v42 }
  0xf2   :  { %3422 = vmatmul.mubr.f32.gmra.mrb[2].mxu0 %v4278_v31 }
  0xf3   :  { %3701 = vmatpush3.bf16.msra.mxu0 %v4293_v42  ;;  %3424 = vmatprep.mubr.f32.mxu0 %v4307_v49 }
  0xf4   :  { %3703 = vmatprep.subr.bf16.mxu0 %v4324_v63 }
  0xf6   :  { %3425 = vmatmul.mubr.f32.gmra.mrb[4].mxu0 %v4314_v53 }
  0xf7   :  { %3705 = vmatpush3.bf16.msra.mxu0 %v4324_v63  ;;  %3427 = vmatprep.mubr.f32.mxu0 %v4334_v6 }
  0xf8   :  { %3707 = vmatprep.subr.bf16.mxu0 %v4353_v15 }
  0xfa   :  { %3428 = vmatmul.mubr.f32.gmra.mrb[6].mxu0 %v4351_v14 }
  0xfb   :  { %3709 = vmatpush3.bf16.msra.mxu0 %v4353_v15  ;;  %3446 = vmatprep.mubr.f32.mxu0 %v4190_v55  ;;  %v4530_v15 = vand.u32 4294901760, %v1816_v4 }
  0xfd   :  { %v4535_v37 = vsub.f32 %v1816_v4, %v4530_v15 }
  0xfe   :  { %3447 = vmatmul.mubr.f32.vlgmr.msra.gmra.mrb[0].mxu0 %v4263_v16 }
  0xff   :  { %3449 = vmatprep.mubr.f32.mxu0 %v4276_v30  ;;  %v1810_v30 = vld [vmem:[%s4645_s5] sm:$0xff]  ;;  %v1903_v24 = vand.u32 4294901760, %v4535_v37 }
 0x102   :  { %3450 = vmatmul.mubr.f32.gmra.mrb[2].mxu0 %v4278_v31  ;;  %v1813_v31 = vsel %vm929_vm1, %v1810_v30, 0 }
 0x103   :  { %3452 = vmatprep.mubr.f32.mxu0 %v4307_v49  ;;  %v4504_v44 = vand.u32 4294901760, %v1813_v31 }
 0x105   :  { %3493 = vmatprep.mubr.f32.mxu1 %v4504_v44  ;;  %v4508_v46 = vsub.f32 %v1813_v31, %v4504_v44 }
 0x106   :  { %3453 = vmatmul.mubr.f32.gmra.mrb[4].mxu0 %v4314_v53  ;;  %v4008_v53 = vmov 1  }
 0x107   :  { %3455 = vmatprep.mubr.f32.mxu0 %v4334_v6  ;;  %v1893_v47 = vand.u32 4294901760, %v4508_v46  ;;  %3950 = vset.pattern.permute.xlu1 %v4008_v53 }
 0x108   :  { %3949 = vset.pattern.permute.xlu0 %v4008_v53  ;;  %1801 = vperm.xlu1 %3950, %v4517_v51  }
 0x109   :  { %v1894_v48 = vsub.f32 %v4508_v46, %v1893_v47  ;;  %1796 = vperm.xlu0 %3949, %v4522_v52  }
 0x10a   :  { %3456 = vmatmul.mubr.f32.gmra.mrb[6].mxu0 %v4351_v14 }
 0x10b   :  { %v3238_v27 = vpop.f32.mrb[0].mxu1  ;;  %v1895_v49 = vand.u32 4294901760, %v1894_v48 }
 0x10c   :  { %v516_v33 = vpop.f32.mrb[1].mxu1 }
 0x10d   :  { %3474 = vmatprep.mubr.f32.mxu0 %v1895_v49 }
 0x10f   :  { %v3241_v34 = vpop.f32.mrb[2].mxu1 }
 0x110   :  { %v530_v35 = vpop.f32.mrb[3].mxu1 }
 0x113   :  { %v3244_v39 = vpop.f32.mrb[4].mxu1 }
 0x114   :  { %v544_v55 = vpop.f32.mrb[5].mxu1 }
 0x117   :  { %v4496_v42 = vpop.f32.mrb[6].mxu1 }
 0x118   :  { %v4498_v16 = vpop.f32.mrb[7].mxu1 }
 0x1d1   :  { %v3448_v61 = vpop.f32.mrb[0].mxu0 }
 0x1d2   :  { %v3830_v63 = vadd.f32 %v3448_v61, %v3238_v27  ;;  %v1746_v2 = vpop.f32.mrb[1].mxu0 }
 0x1d3   :  { %v3831_v3 = vadd.f32 %v1746_v2, %v516_v33  ;;  %v1904_v33 = vsub.f32 %v4535_v37, %v1903_v24 }
 0x1d4   :  { %v1822_v5 = vand.u32 4294901760, %v3830_v63 }
 0x1d5   :  { %v1819_v6 = vand.u32 4294901760, %v3831_v3  ;;  %v3451_v9 = vpop.f32.mrb[2].mxu0 }
 0x1d6   :  { %v1920_v10 = vsub.f32 %v3830_v63, %v1822_v5  ;;  %v3832_v13 = vadd.f32 %v3451_v9, %v3241_v34  ;;  %v1758_v14 = vpop.f32.mrb[3].mxu0 }
 0x1d7   :  { %v4532_v17 = vpack.c.bf16 %v1822_v5, %v1819_v6  ;;  %v1913_v18 = vsub.f32 %v3831_v3, %v1819_v6  ;;  %v3833_v19 = vadd.f32 %v1758_v14, %v530_v35 }
 0x1d8   :  { %v1921_v22 = vand.u32 4294901760, %v1920_v10  ;;  %v1828_v23 = vand.u32 4294901760, %v3832_v13 }
 0x1d9   :  { %v1914_v38 = vand.u32 4294901760, %v1913_v18  ;;  %v1825_v43 = vand.u32 4294901760, %v3833_v19  ;;  %v3454_v45 = vpop.f32.mrb[4].mxu0  ;;  %3711 = vmatprep.subr.bf16.mxu0 %v4532_v17  ;;  %v4538_v59 = vpack.c.bf16 %v1920_v10, %v1913_v18 }
 0x1da   :  { %v1934_v7 = vsub.f32 %v3832_v13, %v1828_v23  ;;  %v3834_v12 = vadd.f32 %v3454_v45, %v3244_v39  ;;  %v1770_v20 = vpop.f32.mrb[5].mxu0  ;;  %3713 = vmatpush3.bf16.msra.mxu0 %v4532_v17  ;;  %v1922_v21 = vsub.f32 %v1920_v10, %v1921_v22 }
 0x1db   :  { %v4542_v26 = vpack.c.bf16 %v1828_v23, %v1825_v43  ;;  %v1927_v25 = vsub.f32 %v3833_v19, %v1825_v43  ;;  %v3835_v32 = vadd.f32 %v1770_v20, %v544_v55  ;;  %v1915_v36 = vsub.f32 %v1913_v18, %v1914_v38 }
 0x1dc   :  { %v1935_v41 = vand.u32 4294901760, %v1934_v7  ;;  %v1834_v50 = vand.u32 4294901760, %v3834_v12  ;;  %v1923_v40 = vand.u32 4294901760, %v1922_v21  ;;  %v4544_v54 = vpack.c.bf16 %v1921_v22, %v1914_v38 }
 0x1dd   :  { %v1928_v58 = vand.u32 4294901760, %v1927_v25  ;;  %v1831_v62 = vand.u32 4294901760, %v3835_v32  ;;  %v3457_v0 = vpop.f32.mrb[6].mxu0  ;;  %3715 = vmatprep.subr.bf16.mxu0 %v4542_v26  ;;  %v1916_v1 = vand.u32 4294901760, %v1915_v36  ;;  %v3746_v8 = vpack.c.bf16 %v1934_v7, %v1927_v25 }
 0x1de   :  { %v1948_v11 = vsub.f32 %v3834_v12, %v1834_v50  ;;  %v3836_v56 = vadd.f32 %v3457_v0, %v4496_v42  ;;  %v1782_v57 = vpop.f32.mrb[7].mxu0  ;;  %3717 = vmatpush3.bf16.msra.mxu0 %v4542_v26  ;;  %v1936_v27 = vsub.f32 %v1934_v7, %v1935_v41  ;;  %v1905_v22 = vand.u32 4294901760, %v1904_v33 }
 0x1df   :  { %v4552_v34 = vpack.c.bf16 %v1834_v50, %v1831_v62  ;;  %v1941_v35 = vsub.f32 %v3835_v32, %v1831_v62  ;;  %v3837_v39 = vadd.f32 %v1782_v57, %v4498_v16  ;;  %v3726_v55 = vpack.c.bf16 %v1923_v40, %v1916_v1  ;;  %v1797_v1 = vpop.permute.xlu0 %1796 }
 0x1e0   :  { %v1949_v30 = vand.u32 4294901760, %v1948_v11  ;;  %v1840_v31 = vand.u32 4294901760, %v3836_v56  ;;  %v1929_v48 = vsub.f32 %v1927_v25, %v1928_v58  ;;  %v1937_v49 = vand.u32 4294901760, %v1936_v27 }
 0x1e1   :  { %v1942_v53 = vand.u32 4294901760, %v1941_v35  ;;  %v1837_v42 = vand.u32 4294901760, %v3837_v39  ;;  %3719 = vmatprep.subr.bf16.mxu0 %v4552_v34  ;;  %3727 = vmatprep.subr.bf16.mxu1 %v3726_v55  ;;  %v3750_v60 = vpack.c.bf16 %v1948_v11, %v1941_v35  ;;  %v3778_v61 = vpack.c.bf16 %v1935_v41, %v1928_v58 }
 0x1e2   :  { %v1962_v63 = vsub.f32 %v3836_v56, %v1840_v31  ;;  %3721 = vmatpush3.bf16.msra.mxu0 %v4552_v34  ;;  %3729 = vmatpush3.bf16.msra.mxu1 %v3726_v55  ;;  %v1930_v2 = vand.u32 4294901760, %v1929_v48  ;;  %v1950_v3 = vsub.f32 %v1948_v11, %v1949_v30  ;;  %v4010_v25 = vmov 3  }
 0x1e3   :  { %v4557_v4 = vpack.c.bf16 %v1840_v31, %v1837_v42  ;;  %v1955_v16 = vsub.f32 %v3837_v39, %v1837_v42  ;;  %v1943_v5 = vsub.f32 %v1941_v35, %v1942_v53  ;;  %v3782_v6 = vpack.c.bf16 %v1949_v30, %v1942_v53 }
 0x1e4   :  { %v1963_v9 = vand.u32 4294901760, %v1962_v63  ;;  %v3730_v10 = vpack.c.bf16 %v1937_v49, %v1930_v2  ;;  %v1951_v13 = vand.u32 4294901760, %v1950_v3  ;;  %v42_v32 = vadd.f32 1e-07, %v4249_v29 }
 0x1e5   :  { %v1956_v14 = vand.u32 4294901760, %v1955_v16  ;;  %3723 = vmatprep.subr.bf16.mxu0 %v4557_v4  ;;  %v1944_v18 = vand.u32 4294901760, %v1943_v5  ;;  %v3754_v19 = vpack.c.bf16 %v1962_v63, %v1955_v16 }
 0x1e6   :  { %3731 = vmatprep.subr.bf16.mxu1 %v3730_v10  ;;  %3725 = vmatpush3.bf16.msra.mxu0 %v4557_v4  ;;  %v1964_v23 = vsub.f32 %v1962_v63, %v1963_v9  ;;  %3973 = vrcp.f32 %v42_v32 }
 0x1e7   :  { %3733 = vmatpush3.bf16.msra.mxu1 %v3730_v10  ;;  %v3734_v38 = vpack.c.bf16 %v1951_v13, %v1944_v18  ;;  %v1957_v43 = vsub.f32 %v1955_v16, %v1956_v14  ;;  %v3786_v45 = vpack.c.bf16 %v1963_v9, %v1956_v14 }
 0x1e8   :  { %v1965_v7 = vand.u32 4294901760, %v1964_v23 }
 0x1e9   :  { %3735 = vmatprep.subr.bf16.mxu1 %v3734_v38  ;;  %v1958_v12 = vand.u32 4294901760, %v1957_v43  ;;  %3475 = vmatmul.mubr.f32.vlgmr.msra.gmra.mrb[8].mxu0 %v1905_v22 }
 0x1eb   :  { %3737 = vmatpush3.bf16.msra.mxu1 %v3734_v38  ;;  %v3738_v20 = vpack.c.bf16 %v1965_v7, %v1958_v12 }
 0x1ed   :  { %3739 = vmatprep.subr.bf16.mxu1 %v3738_v20 }
 0x1ef   :  { %3741 = vmatpush3.bf16.msra.mxu1 %v3738_v20 }
 0x1f0   :  { %3743 = vmatprep.subr.bf16.mxu1 %v4538_v59  ;;  %v3974_v36 = vpop.eup %3973 }
 0x1f1   :  { %v44_v41 = vmul.f32 %v3974_v36, %v42_v32 }
 0x1f2   :  { %3494 = vmatmul.mubr.f32.vlgmr.msra.gmra.mrb[8].mxu1 %v4530_v15 }
 0x1f3   :  { %3745 = vmatpush3.bf16.msra.mxu1 %v4538_v59  ;;  %3512 = vmatprep.mubr.f32.mxu1 %v4508_v46  ;;  %v2400_v46 = vld [vmem:[%s4646_s6] sm:$0xff]  ;;  %v45_v50 = vsub.f32 2.0, %v44_v41 }
 0x1f4   :  { %3747 = vmatprep.subr.bf16.mxu1 %v3746_v8 }
 0x1f5   :  { %v46_v40 = vmul.f32 %v3974_v36, %v45_v50 }
 0x1f7   :  { %3749 = vmatpush3.bf16.msra.mxu1 %v3746_v8  ;;  %v4614_v58 = vmul.f32 %v46_v40, %v4249_v29 }
 0x1f8   :  { %3751 = vmatprep.subr.bf16.mxu1 %v3750_v60 }
 0x1f9   :  { %v2943_v20 = vmul.f32 %v4614_v58, %v4614_v58 }
 0x1fb   :  { %3753 = vmatpush3.bf16.msra.mxu1 %v3750_v60 }
 0x1fc   :  { %3755 = vmatprep.subr.bf16.mxu1 %v3754_v19 }
 0x1ff   :  { %3757 = vmatpush3.bf16.msra.mxu1 %v3754_v19 }
 0x200   :  { %3759 = vmatprep.subr.bf16.mxu1 %v4532_v17 }
 0x202   :  { %3513 = vmatmul.mubr.f32.vlgmr.msra.gmra.mrb[8].mxu1 %v4535_v37 }
 0x203   :  { %3761 = vmatpush3.bf16.msra.mxu1 %v4532_v17  ;;  %3531 = vmatprep.mubr.f32.mxu1 %v1893_v47 }
 0x204   :  { %3763 = vmatprep.subr.bf16.mxu1 %v4542_v26 }
 0x207   :  { %3765 = vmatpush3.bf16.msra.mxu1 %v4542_v26 }
 0x208   :  { %3767 = vmatprep.subr.bf16.mxu1 %v4552_v34 }
 0x20b   :  { %3769 = vmatpush3.bf16.msra.mxu1 %v4552_v34 }
 0x20c   :  { %3771 = vmatprep.subr.bf16.mxu1 %v4557_v4 }
 0x20f   :  { %3773 = vmatpush3.bf16.msra.mxu1 %v4557_v4 }
 0x210   :  { %3775 = vmatprep.subr.bf16.mxu1 %v4544_v54 }
 0x212   :  { %3532 = vmatmul.mubr.f32.vlgmr.msra.gmra.mrb[8].mxu1 %v1903_v24  ;;  %v4009_v24 = vmov 2  }
 0x213   :  { %3777 = vmatpush3.bf16.msra.mxu1 %v4544_v54  ;;  %3550 = vmatprep.mubr.f32.mxu1 %v4504_v44  ;;  %v2401_v54 = vld [vmem:[%s4646_s6 + $0x8] sm:$0xff]  ;;  %s4011_s6 = smov [#allocation2]  }
 0x214   :  { %3779 = vmatprep.subr.bf16.mxu1 %v3778_v61  ;;  %3952 = vset.pattern.permute.xlu0 %v4009_v24  ;;  %v2415_v62 = vsel %vm2410_vm4, %v2401_v54, 0  ;;  %s2959_s15 = sshll.u32 %s4011_s6, 4  ;;  %s2960_s15 = int_to_ptr.vmem [resolvable:$true] %s2959_s15 }
 0x215   :  { %3951 = vset.pattern.permute.xlu1 %v4009_v24  ;;  %2407 = vperm.xlu0 %3952, %v4517_v51   ;;  %v2494_v0 = vand.u32 4294901760, %v2415_v62  ;;  %s3983_s16 = scalar_lea.vmem %s2960_s15, 512  ;;  %p3988_p1 = scmp.lt.s32.totalorder %s2960_s15, %s2960_s15 }
 0x216   :  { %2403 = vperm.xlu1 %3951, %v4522_v52   ;;  %p3984_p0 = scmp.ne.s32.totalorder %s2960_s15, %s3983_s16  ;;  %p3989_p2 = scmp.lt.s32.totalorder %s3983_s16, %s3983_s16 }
 0x217   :  { %3781 = vmatpush3.bf16.msra.mxu1 %v3778_v61  ;;  %v2495_v8 = vsub.f32 %v2415_v62, %v2494_v0 }
 0x218   :  { %3783 = vmatprep.subr.bf16.mxu1 %v3782_v6  ;;  %p3990_p3 = por %p3989_p2, %p3988_p1 }
 0x219   :  { %3954 = vset.pattern.permute.xlu0 %v4010_v25  ;;  %v2496_v35 = vand.u32 4294901760, %v2495_v8 }
 0x21a   :  { %3953 = vset.pattern.permute.xlu1 %v4010_v25  ;;  %p3991_p4 = pnand %p3990_p3, %p3984_p0 }
 0x21b   :  { %3785 = vmatpush3.bf16.msra.mxu1 %v3782_v6  ;;  %2934 = vperm.xlu1 %3953, %v4522_v52   ;;  %v1802_v52 = vpop.permute.xlu1 %1801  ;;  %v2497_v31 = vsub.f32 %v2495_v8, %v2496_v35 }
 0x21c   :  { %3787 = vmatprep.subr.bf16.mxu1 %v3786_v45 }
 0x21d   :  { %v2498_v60 = vand.u32 4294901760, %v2497_v31 }
 0x21f   :  { %3789 = vmatpush3.bf16.msra.mxu1 %v3786_v45  ;;  %2938 = vperm.xlu1 %3953, %v4517_v51   ;;  %v1807_v51 = vrot.slane %v4614_v58, %v4247_v28 }
 0x220   :  { %3791 = vmatprep.subr.bf16.mxu1 %v4532_v17 }
 0x221   :  { %v1809_v11 = vmul.f32 %v1807_v51, %v1802_v52  ;;  %v1808_v57 = vmul.f32 %v1807_v51, %v1797_v1 }
 0x222   :  { %3551 = vmatmul.mubr.f32.vlgmr.msra.gmra.mrb[8].mxu1 %v4530_v15 }
 0x223   :  { %3793 = vmatpush3.bf16.msra.mxu1 %v4532_v17  ;;  %3569 = vmatprep.mubr.f32.mxu1 %v4504_v44  ;;  %v2412_v44 = vsel %vm2410_vm4, %v2400_v46, 0 }
 0x224   :  { %3795 = vmatprep.subr.bf16.mxu1 %v4542_v26  ;;  %v4596_v47 = vand.u32 4294901760, %v2412_v44 }
 0x226   :  { %v4599_v17 = vsub.f32 %v2412_v44, %v4596_v47 }
 0x227   :  { %3797 = vmatpush3.bf16.msra.mxu1 %v4542_v26 }
 0x228   :  { %3799 = vmatprep.subr.bf16.mxu1 %v4552_v34  ;;  %v2486_v37 = vand.u32 4294901760, %v4599_v17 }
 0x22a   :  { %v2487_v59 = vsub.f32 %v4599_v17, %v2486_v37 }
 0x22b   :  { %3801 = vmatpush3.bf16.msra.mxu1 %v4552_v34 }
 0x22c   :  { %3803 = vmatprep.subr.bf16.mxu1 %v4557_v4  ;;  %v2488_v21 = vand.u32 4294901760, %v2487_v59 }
 0x22f   :  { %3805 = vmatpush3.bf16.msra.mxu1 %v4557_v4 }
 0x232   :  { %3570 = vmatmul.mubr.f32.vlgmr.msra.gmra.mrb[8].mxu1 %v4530_v15 }
 0x233   :  { %3576 = vmatprep.mubr.f32.mxu1 %v2488_v21 }
 0x294   :  { %v2408_v9 = vpop.permute.xlu0 %2407 }
 0x295   :  { %v2404_v10 = vpop.permute.xlu1 %2403 }
 0x29a   :  { %v2935_v12 = vpop.permute.xlu1 %2934 }
 0x29e   :  { %v2939_v59 = vpop.permute.xlu1 %2938 }
 0x2bc   :  { %v3476_v15 = vpop.f32.mrb[8].mxu0 }
 0x2bd   :  { %v1897_v26 = vpop.f32.mrb[9].mxu0 }
 0x305   :  { %v3571_v56 = vpop.f32.mrb[8].mxu1 }
 0x306   :  { %v3838_v27 = vadd.f32 %v3571_v56, %v3476_v15  ;;  %v2388_v33 = vpop.f32.mrb[9].mxu1 }
 0x307   :  { %v3839_v34 = vadd.f32 %v2388_v33, %v1897_v26 }
 0x308   :  { %v2399_v39 = vadd.f32 %v3838_v27, %v1809_v11 }
 0x309   :  { %v2398_v55 = vadd.f32 %v3839_v34, %v1808_v57 }
 0x30a   :  { %v2421_v29 = vand.u32 4294901760, %v2399_v39  ;;  %2951 = vst [vmem:[#allocation2 + $0x8] sm:$0xff] %v2399_v39 }
 0x30b   :  { %v2418_v30 = vand.u32 4294901760, %v2398_v55  ;;  %2950 = vst [vmem:[#allocation2] sm:$0xff] %v2398_v55 }
 0x30c   :  { %v2513_v48 = vsub.f32 %v2399_v39, %v2421_v29 }
 0x30d   :  { %v3806_v49 = vpack.c.bf16 %v2421_v29, %v2418_v30  ;;  %v2506_v53 = vsub.f32 %v2398_v55, %v2418_v30 }
 0x30e   :  { %v2514_v42 = vand.u32 4294901760, %v2513_v48 }
 0x30f   :  { %3807 = vmatprep.subr.bf16.mxu1 %v3806_v49  ;;  %v2507_v61 = vand.u32 4294901760, %v2506_v53  ;;  %v3814_v63 = vpack.c.bf16 %v2513_v48, %v2506_v53 }
 0x310   :  { %3809 = vmatpush3.bf16.msra.mxu1 %v3806_v49  ;;  %v2515_v2 = vsub.f32 %v2513_v48, %v2514_v42 }
 0x311   :  { %v2508_v3 = vsub.f32 %v2506_v53, %v2507_v61  ;;  %v3822_v4 = vpack.c.bf16 %v2514_v42, %v2507_v61 }
 0x312   :  { %v2516_v16 = vand.u32 4294901760, %v2515_v2 }
 0x313   :  { %3577 = vmatmul.mubr.f32.vlgmr.msra.gmra.mrb[10].mxu1 %v2498_v60  ;;  %v2509_v5 = vand.u32 4294901760, %v2508_v3 }
 0x314   :  { %3583 = vmatprep.mubr.f32.mxu1 %v4596_v47 }
 0x315   :  { %v3810_v6 = vpack.c.bf16 %v2516_v16, %v2509_v5 }
 0x317   :  { %3811 = vmatprep.subr.bf16.mxu1 %v3810_v6 }
 0x318   :  { %3813 = vmatpush3.bf16.msra.mxu1 %v3810_v6 }
 0x319   :  { %3815 = vmatprep.subr.bf16.mxu1 %v3814_v63 }
 0x31b   :  { %3584 = vmatmul.mubr.f32.vlgmr.msra.gmra.mrb[10].mxu1 %v2494_v0 }
 0x31c   :  { %3817 = vmatpush3.bf16.msra.mxu1 %v3814_v63  ;;  %3590 = vmatprep.mubr.f32.mxu1 %v4599_v17 }
 0x31d   :  { %3819 = vmatprep.subr.bf16.mxu1 %v3806_v49 }
 0x323   :  { %3591 = vmatmul.mubr.f32.vlgmr.msra.gmra.mrb[10].mxu1 %v2495_v8 }
 0x324   :  { %3821 = vmatpush3.bf16.msra.mxu1 %v3806_v49  ;;  %3597 = vmatprep.mubr.f32.mxu1 %v2486_v37 }
 0x325   :  { %3823 = vmatprep.subr.bf16.mxu1 %v3822_v4 }
 0x32b   :  { %3598 = vmatmul.mubr.f32.vlgmr.msra.gmra.mrb[10].mxu1 %v2496_v35 }
 0x32c   :  { %3825 = vmatpush3.bf16.msra.mxu1 %v3822_v4  ;;  %3604 = vmatprep.mubr.f32.mxu1 %v4596_v47 }
 0x32d   :  { %3827 = vmatprep.subr.bf16.mxu1 %v3806_v49 }
 0x333   :  { %3605 = vmatmul.mubr.f32.vlgmr.msra.gmra.mrb[10].mxu1 %v2494_v0 }
 0x334   :  { %3829 = vmatpush3.bf16.msra.mxu1 %v3806_v49  ;;  %3611 = vmatprep.mubr.f32.mxu1 %v4596_v47  ;;  %v2947_v47 = vrot.slane %v2943_v20, %v4247_v28 }
 0x33b   :  { %3612 = vmatmul.mubr.f32.vlgmr.msra.gmra.mrb[10].mxu1 %v2494_v0 }
 0x40e   :  { %v3613_v13 = vpop.f32.mrb[10].mxu1 }
 0x40f   :  { %v3840_v14 = vadd.f32 %v3613_v13, %v2408_v9  ;;  %v2909_v18 = vpop.f32.mrb[11].mxu1 }
 0x410   :  { %v3841_v19 = vadd.f32 %v2909_v18, %v2404_v10 }
 0x411   :  { %v2971_v22 = vmul.f32 -1.442695, %v3840_v14 }
 0x412   :  { %v2970_v23 = vmul.f32 -1.442695, %v3841_v19 }
 0x413   :  { %3975 = vpow2.f32 %v2971_v22 }
 0x414   :  { %3977 = vpow2.f32 %v2970_v23 }
 0x41d   :  { %v3976_v38 = vpop.eup %3975 }
 0x41e   :  { %v3978_v43 = vpop.eup %3977  ;;  %v2926_v45 = vadd.f32 1.0, %v3976_v38 }
 0x41f   :  { %v2925_v7 = vadd.f32 1.0, %v3978_v43 }
 0x420   :  { %3979 = vrcp.f32 %v2926_v45 }
 0x421   :  { %3981 = vrcp.f32 %v2925_v7 }
 0x42a   :  { %v3980_v46 = vpop.eup %3979 }
 0x42b   :  { %v3982_v44 = vpop.eup %3981  ;;  %v2932_v17 = vmul.f32 %v3980_v46, %v3980_v46 }
 0x42c   :  { %v2931_v37 = vmul.f32 %v3982_v44, %v3982_v44 }
 0x42d   :  { %v2942_v21 = vmul.f32 %v2939_v59, %v2932_v17 }
 0x42e   :  { %v2941_v15 = vmul.f32 %v2935_v12, %v2931_v37 }
 0x42f   :  { %v2949_v24 = vmul.f32 %v2947_v47, %v2942_v21 }
 0x430   :  { %v2948_v26 = vmul.f32 %v2947_v47, %v2941_v15 }
 0x431   :  { %2953 = vst [vmem:[#allocation2 + $0x18] sm:$0xff] %v2949_v24 }
 0x432   :  { %2952 = vst [vmem:[#allocation2 + $0x10] sm:$0xff] %v2948_v26 }
 0x433   :  { %3994 = shalt.err (!%p3991_p4)
}
 0x434   :  { %s3995_s17 = scalar_lea.hbm %s4647_s7, 512 }
 0x435   :  { %p3996_p5 = scmp.ne.s32.totalorder %s4647_s7, %s3995_s17  ;;  %p3999_p6 = scmp.lt.u32.totalorder %s3995_s17, %s4647_s7 }
 0x437   :  { %p4001_p7 = pnand %p3999_p6, %p3996_p5 }
 0x439   :  { %4004 = shalt.err (!%p4001_p7)
}
 0x43a   :  { %s4012_s22 = smov 128   ;;  %s4013_s23 = smov 8  }
 0x43b   :  { %2965 = dma.vmem_to_hbm [thread:$0]  %s2960_s15, 512, %s4647_s7, [#allocation3], %s4012_s22, %s4012_s22, %s4013_s23  }
 0x43c   :  { %4005 = dma.done.wait [#allocation3], 512  }
 0x43d   :  { %4006 = vsyncadd [#allocation3], 4294966784 }
 0x43e   :  { %2969 = vsyncpa [#allocation3], 1 }

</bundles_post_ra>
